<compile_context>
chip_gen: v6e
topology: v6e:2x2x1
jax: 0.10.0
libtpu: 0.0.40
codegen_flags: <defaults>
</compile_context>

<pallas_src>
import functools

import jax
import jax.numpy as jnp
from jax.experimental import pallas as pl
from jax.experimental.pallas import tpu as pltpu


def _round_up(n, m):
    return ((n + m - 1) // m) * m


def _tpu_generation():
    try:
        kind = jax.devices()[0].device_kind.lower()
    except Exception:
        return None
    if "v5 lite" in kind or "v5e" in kind or "v5litepod" in kind:
        return "v5e"
    if "v6" in kind:
        return "v6e"
    if "v7" in kind:
        return "v7x"
    return None


# vmem ceiling (scoped limit we are willing to request) and preferred M tile.
_GEN_CONFIG = {
    "v5e": dict(vmem_ceiling=100 << 20, preferred_tile=256),  # 4x128 MXU, 128 MiB VMEM
    "v6e": dict(vmem_ceiling=100 << 20, preferred_tile=512),  # 2x256 MXU, 128 MiB VMEM
    "v7x": dict(vmem_ceiling=56 << 20,  preferred_tile=512),  # 2x256 MXU, 64 MiB VMEM
    None:  dict(vmem_ceiling=64 << 20,  preferred_tile=256),
}


def _mlp_kernel(num_layers, compute_dtype, *refs):
    """Fused MLP over one (TB, p0) batch tile.

    refs layout: x, w_0..w_{L-1}, b_0..b_{L-1}, out
      x_ref:    (TB, p0)          activations, already in compute dtype
      w_ref_i:  (p_i, p_{i+1})    per-layer zero-padded weight (resident)
      b_ref_i:  (1,  p_{i+1})     per-layer zero-padded bias, f32 (resident)
      out_ref:  (TB, p_L)         padded output (sliced to true width outside)
    Every layer is Linear followed by ReLU, matching the PyTorch module.
    """
    x_ref = refs[0]
    w_refs = refs[1:1 + num_layers]
    b_refs = refs[1 + num_layers:1 + 2 * num_layers]
    out_ref = refs[1 + 2 * num_layers]

    h = x_ref[...]
    if h.dtype != compute_dtype:
        h = h.astype(compute_dtype)
    for li in range(num_layers):
        acc = jnp.dot(h, w_refs[li][...], preferred_element_type=jnp.float32)
        acc = jnp.maximum(acc + b_refs[li][...], 0.0)  # f32 bias-add + ReLU
        h = acc if li == num_layers - 1 else acc.astype(compute_dtype)
    out_ref[...] = h.astype(out_ref.dtype)


def neural_learner_forward(x, weights, biases, *, batch_tile=None,
                           param_dtype=jnp.float32, out_dtype=jnp.float32):
    """Run the fused MLP.

    weights[i]: (in_i, out_i)  (already transposed vs. PyTorch's (out, in))
    biases[i]:  (1, out_i)
    param_dtype: jnp.float32 or jnp.bfloat16 (weights + activations fed to the
                 MXU; accumulation and the bias/ReLU epilogue stay f32).
    """
    num_layers = len(weights)
    batch, in_dim = x.shape
    dims = [in_dim] + [w.shape[1] for w in weights]
    # Per-layer lane-dense padding (each feature dim to its own multiple of 128).
    p = [_round_up(d, 128) for d in dims]
    p_max = max(p)

    act_bytes = jnp.dtype(param_dtype).itemsize
    out_bytes = jnp.dtype(out_dtype).itemsize
    weight_bytes = sum(p[i] * p[i + 1] * act_bytes for i in range(num_layers))
    bias_bytes = sum(p[i + 1] * 4 for i in range(num_layers))

    gen = _tpu_generation()
    cfg = _GEN_CONFIG.get(gen, _GEN_CONFIG[None])
    vmem_ceiling = cfg["vmem_ceiling"]
    preferred = batch_tile if batch_tile is not None else cfg["preferred_tile"]

    # Pick the largest batch tile (sublane-dense, multiple of 16 so it works
    # for f32 and bf16) that fits the VMEM budget together with the
    # single-buffered weights and a live f32 accumulator.
    pref = _round_up(min(preferred, _round_up(batch, 16)), 16)
    cands = [c for c in (512, 384, 256, 128, 64, 32, 16) if c <= pref]
    if not cands or cands[0] != pref:
        cands = [pref] + cands
    budget = int(vmem_ceiling * 0.85)

    def footprint(tb):
        return (2 * tb * p[0] * act_bytes      # double-buffered input tile
                + 2 * tb * p[-1] * out_bytes   # double-buffered output tile
                + weight_bytes + bias_bytes    # single-buffered residents
                + tb * p_max * 4)              # f32 accumulator headroom

    tb = cands[-1]
    for c in cands:
        if footprint(c) <= budget:
            tb = c
            break

    b_pad = _round_up(batch, tb)
    grid_steps = b_pad // tb

    # Pad operands.  Padded weight rows/cols and biases are zero and
    # ReLU(0)=0, so padded feature columns stay exactly zero through every
    # layer; padded batch rows are sliced off at the end.
    x_p = jnp.zeros((b_pad, p[0]), param_dtype).at[:batch, :in_dim].set(
        x.astype(param_dtype))
    w_pads, b_pads = [], []
    for li, (w, b) in enumerate(zip(weights, biases)):
        wp = jnp.zeros((p[li], p[li + 1]), param_dtype)
        wp = wp.at[:w.shape[0], :w.shape[1]].set(w.astype(param_dtype))
        bf = b.reshape(-1).astype(jnp.float32)
        bp = jnp.zeros((1, p[li + 1]), jnp.float32).at[0, :bf.shape[0]].set(bf)
        w_pads.append(wp)
        b_pads.append(bp)

    # Grid-invariant operands: constant index_map + single buffer.
    in_specs = [pl.BlockSpec((tb, p[0]), lambda i: (i, 0))]
    in_specs += [
        pl.BlockSpec((p[li], p[li + 1]), lambda i: (0, 0),
                     pipeline_mode=pl.Buffered(1))
        for li in range(num_layers)
    ]
    in_specs += [
        pl.BlockSpec((1, p[li + 1]), lambda i: (0, 0),
                     pipeline_mode=pl.Buffered(1))
        for li in range(num_layers)
    ]
    out_spec = pl.BlockSpec((tb, p[-1]), lambda i: (i, 0))

    vmem_limit = min(vmem_ceiling, max(int(footprint(tb) * 1.3), 32 << 20))

    # Megacore split only pays off when the grid is long enough that each
    # core amortizes its own copy of the resident weights.
    semantics = "parallel" if grid_steps > 4 else "arbitrary"

    kernel = functools.partial(_mlp_kernel, num_layers, param_dtype)
    out_p = pl.pallas_call(
        kernel,
        out_shape=jax.ShapeDtypeStruct((b_pad, p[-1]), out_dtype),
        grid=(grid_steps,),
        in_specs=in_specs,
        out_specs=out_spec,
        compiler_params=pltpu.CompilerParams(
            dimension_semantics=(semantics,),
            vmem_limit_bytes=vmem_limit,
        ),
    )(x_p, *w_pads, *b_pads)

    return out_p[:batch, :dims[-1]]


def init_params(opt, key):
    """Deterministic parameter init matching nn.Linear shapes.

    PyTorch stores W as (out, in); we keep the transposed (in, out) layout so
    the kernel does h @ W directly (semantically identical to x @ W.T + b).
    """
    weights, biases = [], []
    for i in range(len(opt) - 1):
        key, kw, kb = jax.random.split(key, 3)
        fan_in, fan_out = opt[i], opt[i + 1]
        bound = 1.0 / jnp.sqrt(float(fan_in))
        w = jax.random.uniform(kw, (fan_in, fan_out), jnp.float32, -bound, bound)
        b = jax.random.uniform(kb, (1, fan_out), jnp.float32, -bound, bound)
        weights.append(w)
        biases.append(b)
    return weights, biases


def reference_forward(x, weights, biases):
    h = x
    for w, b in zip(weights, biases):
        h = jnp.maximum(h @ w + b, 0.0)
    return h


if __name__ == "__main__":
    # opt defines layer widths: 3 Linear(+ReLU) layers.
    opt = [32, 64, 48, 16]
    batch = 384  # not a tile multiple -> exercises batch padding + slicing

    key = jax.random.PRNGKey(0)
    key, kx = jax.random.split(key)
    x = jax.random.normal(kx, (batch, opt[0]), jnp.float32)
    weights, biases = init_params(opt, key)

    ref = reference_forward(x, weights, biases)

    # f32 path (default): exact match vs reference.
    out = jax.block_until_ready(neural_learner_forward(x, weights, biases))
    assert out.shape == (batch, opt[-1])
    assert jnp.allclose(out, ref, atol=1e-5, rtol=1e-5), "f32 mismatch vs reference"

    # bf16 weights/activations (v6e/v7x MXU rate, half the weight/activation
    # DMA bytes), f32 accumulation + f32 epilogue.
    out_bf16 = jax.block_until_ready(
        neural_learner_forward(x, weights, biases, param_dtype=jnp.bfloat16))
    assert out_bf16.shape == (batch, opt[-1])
    assert jnp.allclose(out_bf16, ref, atol=5e-2, rtol=5e-2), "bf16 mismatch"

    print("KERNEL_OK")
</pallas_src>

<mosaic_0001>
module attributes {stable_mosaic.version = 11 : i64} {
  func.func @_mlp_kernel(%arg0: i32, %arg1: memref<256x128xf32, #tpu.memory_space<vmem>>, %arg2: memref<128x128xf32, #tpu.memory_space<vmem>>, %arg3: memref<128x128xf32, #tpu.memory_space<vmem>>, %arg4: memref<128x128xf32, #tpu.memory_space<vmem>>, %arg5: memref<1x128xf32, #tpu.memory_space<vmem>>, %arg6: memref<1x128xf32, #tpu.memory_space<vmem>>, %arg7: memref<1x128xf32, #tpu.memory_space<vmem>>, %arg8: memref<256x128xf32, #tpu.memory_space<vmem>>) attributes {dimension_semantics = [#tpu.dimension_semantics<arbitrary>], iteration_bounds = array<i64: 2>, scalar_prefetch = 0 : i64, scratch_operands = 0 : i64, tpu.core_type = #tpu.core_type<tc>, window_params = [{transform_indices = @transform_0, window_bounds = array<i64: 256, 128>}, {pipeline_mode = #tpu.pipeline_mode<synchronous>, transform_indices = @transform_1, window_bounds = array<i64: 128, 128>}, {pipeline_mode = #tpu.pipeline_mode<synchronous>, transform_indices = @transform_2, window_bounds = array<i64: 128, 128>}, {pipeline_mode = #tpu.pipeline_mode<synchronous>, transform_indices = @transform_3, window_bounds = array<i64: 128, 128>}, {pipeline_mode = #tpu.pipeline_mode<synchronous>, transform_indices = @transform_4, window_bounds = array<i64: 1, 128>}, {pipeline_mode = #tpu.pipeline_mode<synchronous>, transform_indices = @transform_5, window_bounds = array<i64: 1, 128>}, {pipeline_mode = #tpu.pipeline_mode<synchronous>, transform_indices = @transform_6, window_bounds = array<i64: 1, 128>}, {transform_indices = @transform_7, window_bounds = array<i64: 256, 128>}]} {
    %c0 = arith.constant 0 : index
    %c0_0 = arith.constant 0 : index
    %0 = vector.load %arg1[%c0, %c0_0] : memref<256x128xf32, #tpu.memory_space<vmem>>, vector<256x128xf32>
    %c0_1 = arith.constant 0 : index
    %c0_2 = arith.constant 0 : index
    %1 = vector.load %arg2[%c0_1, %c0_2] : memref<128x128xf32, #tpu.memory_space<vmem>>, vector<128x128xf32>
    %cst = arith.constant dense<0.000000e+00> : vector<256x128xf32>
    %2 = tpu.matmul %0, %1, %cst {dimension_numbers = #tpu.dot_dimension_numbers<[1], [0], [0], [1], [0, 0, 1, 1], [], []>} : vector<256x128xf32>, vector<128x128xf32>, vector<256x128xf32> -> vector<256x128xf32>
    %c0_3 = arith.constant 0 : index
    %c0_4 = arith.constant 0 : index
    %3 = vector.load %arg5[%c0_3, %c0_4] : memref<1x128xf32, #tpu.memory_space<vmem>>, vector<1x128xf32>
    %4 = vector.broadcast %3 : vector<1x128xf32> to vector<256x128xf32>
    %5 = arith.addf %2, %4 : vector<256x128xf32>
    %cst_5 = arith.constant 0.000000e+00 : f32
    %6 = vector.broadcast %cst_5 : f32 to vector<256x128xf32>
    %7 = arith.maximumf %5, %6 : vector<256x128xf32>
    %c0_6 = arith.constant 0 : index
    %c0_7 = arith.constant 0 : index
    %8 = vector.load %arg3[%c0_6, %c0_7] : memref<128x128xf32, #tpu.memory_space<vmem>>, vector<128x128xf32>
    %cst_8 = arith.constant dense<0.000000e+00> : vector<256x128xf32>
    %9 = tpu.matmul %7, %8, %cst_8 {dimension_numbers = #tpu.dot_dimension_numbers<[1], [0], [0], [1], [0, 0, 1, 1], [], []>} : vector<256x128xf32>, vector<128x128xf32>, vector<256x128xf32> -> vector<256x128xf32>
    %c0_9 = arith.constant 0 : index
    %c0_10 = arith.constant 0 : index
    %10 = vector.load %arg6[%c0_9, %c0_10] : memref<1x128xf32, #tpu.memory_space<vmem>>, vector<1x128xf32>
    %11 = vector.broadcast %10 : vector<1x128xf32> to vector<256x128xf32>
    %12 = arith.addf %9, %11 : vector<256x128xf32>
    %cst_11 = arith.constant 0.000000e+00 : f32
    %13 = vector.broadcast %cst_11 : f32 to vector<256x128xf32>
    %14 = arith.maximumf %12, %13 : vector<256x128xf32>
    %c0_12 = arith.constant 0 : index
    %c0_13 = arith.constant 0 : index
    %15 = vector.load %arg4[%c0_12, %c0_13] : memref<128x128xf32, #tpu.memory_space<vmem>>, vector<128x128xf32>
    %cst_14 = arith.constant dense<0.000000e+00> : vector<256x128xf32>
    %16 = tpu.matmul %14, %15, %cst_14 {dimension_numbers = #tpu.dot_dimension_numbers<[1], [0], [0], [1], [0, 0, 1, 1], [], []>} : vector<256x128xf32>, vector<128x128xf32>, vector<256x128xf32> -> vector<256x128xf32>
    %c0_15 = arith.constant 0 : index
    %c0_16 = arith.constant 0 : index
    %17 = vector.load %arg7[%c0_15, %c0_16] : memref<1x128xf32, #tpu.memory_space<vmem>>, vector<1x128xf32>
    %18 = vector.broadcast %17 : vector<1x128xf32> to vector<256x128xf32>
    %19 = arith.addf %16, %18 : vector<256x128xf32>
    %cst_17 = arith.constant 0.000000e+00 : f32
    %20 = vector.broadcast %cst_17 : f32 to vector<256x128xf32>
    %21 = arith.maximumf %19, %20 : vector<256x128xf32>
    %c0_18 = arith.constant 0 : index
    %c0_19 = arith.constant 0 : index
    %22 = vector.load %arg8[%c0_18, %c0_19] : memref<256x128xf32, #tpu.memory_space<vmem>>, vector<256x128xf32>
    tpu.vector_store %arg8[%c0_18, %c0_19], %21 {strides = array<i32>} : memref<256x128xf32, #tpu.memory_space<vmem>>, vector<256x128xf32>,
    return
  }
  func.func @transform_0(%arg0: i32) -> (i32, i32) {
    %c0_i32 = arith.constant 0 : i32
    %c0_i32_0 = arith.constant 0 : i32
    return %arg0, %c0_i32 : i32, i32
  }
  func.func @transform_1(%arg0: i32) -> (i32, i32) {
    %c0_i32 = arith.constant 0 : i32
    %c0_i32_0 = arith.constant 0 : i32
    %c0_i32_1 = arith.constant 0 : i32
    return %c0_i32, %c0_i32_0 : i32, i32
  }
  func.func @transform_2(%arg0: i32) -> (i32, i32) {
    %c0_i32 = arith.constant 0 : i32
    %c0_i32_0 = arith.constant 0 : i32
    %c0_i32_1 = arith.constant 0 : i32
    return %c0_i32, %c0_i32_0 : i32, i32
  }
  func.func @transform_3(%arg0: i32) -> (i32, i32) {
    %c0_i32 = arith.constant 0 : i32
    %c0_i32_0 = arith.constant 0 : i32
    %c0_i32_1 = arith.constant 0 : i32
    return %c0_i32, %c0_i32_0 : i32, i32
  }
  func.func @transform_4(%arg0: i32) -> (i32, i32) {
    %c0_i32 = arith.constant 0 : i32
    %c0_i32_0 = arith.constant 0 : i32
    %c0_i32_1 = arith.constant 0 : i32
    return %c0_i32, %c0_i32_0 : i32, i32
  }
  func.func @transform_5(%arg0: i32) -> (i32, i32) {
    %c0_i32 = arith.constant 0 : i32
    %c0_i32_0 = arith.constant 0 : i32
    %c0_i32_1 = arith.constant 0 : i32
    return %c0_i32, %c0_i32_0 : i32, i32
  }
  func.func @transform_6(%arg0: i32) -> (i32, i32) {
    %c0_i32 = arith.constant 0 : i32
    %c0_i32_0 = arith.constant 0 : i32
    %c0_i32_1 = arith.constant 0 : i32
    return %c0_i32, %c0_i32_0 : i32, i32
  }
  func.func @transform_7(%arg0: i32) -> (i32, i32) {
    %c0_i32 = arith.constant 0 : i32
    %c0_i32_0 = arith.constant 0 : i32
    return %arg0, %c0_i32 : i32, i32
  }
}

</mosaic_0001>

<bundles_post_ra>
// kernel: tpu_custom_call.1
= control target key start
LH: loop header
LB: loop body
LE: loop exit
PB: predicated region body
PF: predicated region fallthrough
CT: control target
= control target key end

     0   :  { %s2519_s0 = inlined_call_operand.hbm [shape: f32[512,128], index: 0, kind: input, shape index: {}]   ;;  %s2520_s1 = inlined_call_operand.hbm [shape: f32[128,128], index: 1, kind: input, shape index: {}]   ;;  %s2521_s2 = inlined_call_operand.hbm [shape: f32[128,128], index: 2, kind: input, shape index: {}]   ;;  %s2522_s3 = inlined_call_operand.hbm [shape: f32[128,128], index: 3, kind: input, shape index: {}]   ;;  %s2523_s4 = inlined_call_operand.vmem [shape: f32[1,128], index: 4, kind: input, shape index: {}]   ;;  %s2524_s5 = inlined_call_operand.vmem [shape: f32[1,128], index: 5, kind: input, shape index: {}]   ;;  %s2525_s6 = inlined_call_operand.vmem [shape: f32[1,128], index: 6, kind: input, shape index: {}]   ;;  %s2526_s7 = inlined_call_operand.hbm [shape: f32[512,128], index: 7, kind: output, shape index: {}]  }
   0x1   :  { %2533 = sst [smem:[#allocation15_spill]] %s2520_s1 }
   0x2   :  { %12 = vsyncpa [#allocation3], 0 }
   0x3   :  { %14 = vsyncpa [#allocation3 + $0x1], 0 }
   0x4   :  { %15 = vsyncpa [#allocation6], 0 }
   0x5   :  { %16 = vsyncpa [#allocation9], 0 }
   0x6   :  { %17 = vsyncpa [#allocation4], 0 }
   0x7   :  { %19 = vsyncpa [#allocation4 + $0x1], 0  ;;  %s2114_s24 = smov 0   ;;  %s2116_s25 = smov 0  }
   0x8   :  { %s2118_s26 = smov 0   ;;  %s2120_s27 = smov 0  }
   0x9 LB: > { %s2135_s28 = sadd.s32 4294967295, %s2063_s27   ;;  %s1363_s29 = sadd.s32 4294967294, %s2063_s27   ;;  %s2063_s27 = sphi %s2120_s27, %s2555_s27   ;;  %s2059_s26 = sphi %s2118_s26, %s2554_s26   ;;  %s2055_s25 = sphi %s2116_s25, %s2553_s25   ;;  %s2051_s24 = sphi %s2114_s24, %s2552_s24  }
   0xa   : > { %p45_p0 = scmp.ne.s32.totalorder %s2055_s25, %s2051_s24  ;;  %p2527_p1 = scmp.eq.s32.totalorder %s2135_s28, 0 }
   0xb   : > { %p195_p2 = scmp.eq.s32.totalorder %s2135_s28, 1  ;;  %p201_p3 = scmp.eq.s32.totalorder %s1363_s29, 1 }
   0xc   : > { %p2144_p4 = por %p2527_p1, %p45_p0  ;;  %p1364_p5 = scmp.ge.s32.totalorder %s2063_s27, 1 }
   0xd   : > { %p2149_p6 = por %p201_p3, %p45_p0  ;;  %p208_p7 = scmp.lt.s32.totalorder %s2063_s27, 3 }
   0xe   : > { %s2534_s30 = scalar_select %p2144_p4, 1, 0 }
   0xf   : > { %s2535_s8 = scalar_select %p2149_p6, 1, 0 }
  0x10   : > { %p2154_p8 = pnand %p1364_p5, %p208_p7  ;;  %s2065_s10 = smov [#allocation5]  }
  0x11   : > { %s220_s11 = sshll.u32 %s2065_s10, 4  ;;  %s2066_s13 = smov [#allocation7]   ;;  %s221_s11 = int_to_ptr.vmem [resolvable:$true] %s220_s11 }
  0x12   : > { %s2536_s9 = scalar_select %p2154_p8, 1, 0 }
  0x13   : > { %p1820_p9 = pneg %p2154_p8  ;;  %s233_s14 = sshll.u32 %s2066_s13, 4  ;;  %s234_s14 = int_to_ptr.vmem [resolvable:$true] %s233_s14 }
  0x14   : > { %s2067_s15 = smov [#allocation8]   ;;  %s1896_s17 = scalar_lea.vmem %s221_s11, 2048 }
  0x15   : > { %p2163_p11 = pnand %p1820_p9, %p2527_p1  ;;  %s246_s16 = sshll.u32 %s2067_s15, 4  ;;  %s247_s16 = int_to_ptr.vmem [resolvable:$true] %s246_s16 }
  0x16   : > { %p1897_p13 = scmp.ne.s32.totalorder %s221_s11, %s1896_s17  ;;  %p1904_p5 = scmp.lt.s32.totalorder %s221_s11, %s221_s11 }
  0x17   : > { %p1887_p12 = pneg %p2163_p11  ;;  %p1905_p7 = scmp.lt.s32.totalorder %s1896_s17, %s1896_s17 }
  0x19   : > { %p1899_p0 = pnand %p1897_p13, %p1887_p12  ;;  %p1906_p9 = por %p1905_p7, %p1904_p5 }
  0x1b   : > { %p1900_p3 = pneg %p1899_p0 }
  0x1d   : > { %p1907_p10 = pnand %p1906_p9, %p1900_p3 }
  0x1f   : > { %1910 = shalt.err (!%p1907_p10)
}
  0x20   : > { %s2528_s18 = smov 128   ;;  %s2529_s19 = smov 8  }
  0x21   : > { %s2538_s1 = sld [smem:[#allocation15_spill]]  ;;  %s1922_s22 = scalar_lea.vmem %s234_s14, 2048 }
  0x22   : > { %p1923_p13 = scmp.ne.s32.totalorder %s234_s14, %s1922_s22  ;;  %p1930_p3 = scmp.lt.s32.totalorder %s234_s14, %s234_s14 }
  0x23   : > { %p1931_p10 = scmp.lt.s32.totalorder %s1922_s22, %s1922_s22 }
  0x24   : > { %p1925_p0 = pnand %p1923_p13, %p1887_p12 }
  0x25   : > { %p1932_p7 = por %p1931_p10, %p1930_p3 }
  0x26   : > { %p1926_p5 = pneg %p1925_p0 }
  0x27   : > { %1823 = dma.hbm_to_vmem [thread:$0]  (!%p2163_p11), %s2538_s1, 2048, %s221_s11, [#allocation6], %s2528_s18, %s2528_s18, %s2529_s19  }
  0x28   : > { %p1933_p9 = pnand %p1932_p7, %p1926_p5 }
  0x2a   : > { %1936 = shalt.err (!%p1933_p9)
}
  0x2b   : > { %1826 = dma.hbm_to_vmem [thread:$0]  (!%p2163_p11), %s2521_s2, 2048, %s234_s14, [#allocation6], %s2528_s18, %s2528_s18, %s2529_s19  }
  0x2c   : > { %s1948_s10 = scalar_lea.vmem %s247_s16, 2048  ;;  %p1956_p3 = scmp.lt.s32.totalorder %s247_s16, %s247_s16 }
  0x2d   : > { %p1949_p1 = scmp.ne.s32.totalorder %s247_s16, %s1948_s10  ;;  %p1957_p5 = scmp.lt.s32.totalorder %s1948_s10, %s1948_s10 }
  0x2f   : > { %p1951_p13 = pnand %p1949_p1, %p1887_p12  ;;  %p1958_p10 = por %p1957_p5, %p1956_p3 }
  0x31   : > { %p1952_p0 = pneg %p1951_p13 }
  0x33   : > { %p1959_p7 = pnand %p1958_p10, %p1952_p0 }
  0x35   : > { %1962 = shalt.err (!%p1959_p7)
}
  0x36   : > { %1829 = dma.hbm_to_vmem [thread:$0]  (!%p2163_p11), %s2522_s3, 2048, %s247_s16, [#allocation9], %s2528_s18, %s2528_s18, %s2529_s19  }
  0x37   : > { %s2203_s14 = sadd.s32 1, %s2063_s27   ;;  %s32_s15 = sadd.s32 1, %s2059_s26 }
  0x38   : > { %s29_s12 = ssub.s32 %s2063_s27, %s2203_s14  ;;  %p39_p12 = scmp.ne.s32.totalorder %s2059_s26, %s2055_s25 }
  0x39   : > { %p30_p1 = scmp.eq.s32.totalorder %s29_s12, 0  ;;  %p40_p9 = scmp.eq.s32.totalorder %s2063_s27, 0 }
  0x3a   : > { %p1841_p13 = scmp.lt.s32.totalorder %s2063_s27, 2  ;;  %p2217_p3 = por %p195_p2, %p39_p12 }
  0x3b   : > { %s2213_s17 = scalar_select %p30_p1, %s2059_s26, %s32_s15  }
  0x3c   : > { %p41_p0 = por %p40_p9, %p39_p12  ;;  %s269_s21 = sand.u32 1, %s2059_s26  }
  0x3d   : > { %s2539_s20 = scalar_select %p2217_p3, 1, 0 }
  0x3e   : > { %s1386_s22 = sshll.u32 %s2063_s27, 12  ;;  %s1369_s16 = sshll.u32 %s269_s21, 8 }
  0x3f   : > { %s2226_s10 = scalar_lea.hbm %s2519_s0, %s1386_s22  ;;  %s273_s11 = scalar_lea.vmem [#allocation2], %s1369_s16 }
  0x40   : > { %s280_s13 = sshll.u32 %s273_s11, 4  ;;  %p2228_p11 = pnand %p1841_p13, %p41_p0  ;;  %s2232_s13 = int_to_ptr.vmem [resolvable:$true] %s280_s13 }
  0x41   : > { %s2234_s15 = scalar_lea.sflag [#allocation3], %s269_s21  ;;  %s1963_s18 = scalar_lea.hbm %s2226_s10, 4096 }
  0x42   : > { %p1964_p2 = scmp.ne.s32.totalorder %s2226_s10, %s1963_s18  ;;  %p1965_p5 = pneg %p2228_p11 }
  0x43   : > { %s1968_s16 = scalar_lea.hbm %s2519_s0, 8192  ;;  %p1969_p1 = scmp.lt.s32.totalorder %s2226_s10, %s2519_s0 }
  0x44   : > { %p1966_p10 = pnand %p1965_p5, %p1964_p2  ;;  %p1970_p12 = scmp.lt.s32.totalorder %s1968_s16, %s1963_s18 }
  0x46   : > { %p1967_p7 = pneg %p1966_p10  ;;  %p1971_p9 = por %p1970_p12, %p1969_p1 }
  0x48   : > { %p1972_p13 = pnand %p1971_p9, %p1967_p7 }
  0x4a   : > { %1975 = shalt.err (!%p1972_p13)
}
  0x4b   : > { %s1976_s21 = scalar_lea.vmem %s2232_s13, 4096  ;;  %s2070_s19 = smov [#allocation2]  }
  0x4c   : > { %p1977_p0 = scmp.ne.s32.totalorder %s2232_s13, %s1976_s21  ;;  %s1981_s1 = sshll.u32 %s2070_s19, 4  ;;  %s1982_s1 = int_to_ptr.vmem [resolvable:$false] %s1981_s1 }
  0x4d   : > { %s1983_s22 = scalar_lea.vmem %s1982_s1, 8192  ;;  %p1984_p10 = scmp.lt.s32.totalorder %s2232_s13, %s1982_s1 }
  0x4e   : > { %p1979_p6 = pnand %p1977_p0, %p1965_p5  ;;  %p1985_p3 = scmp.lt.s32.totalorder %s1983_s22, %s1976_s21 }
  0x50   : > { %p1980_p2 = pneg %p1979_p6  ;;  %p1986_p4 = por %p1985_p3, %p1984_p10 }
  0x52   : > { %p1987_p8 = pnand %p1986_p4, %p1980_p2 }
  0x54   : > { %1990 = shalt.err (!%p1987_p8)
}
  0x55   : > { %s2541_s18 = smov 8   ;;  %s2542_s23 = smov 128  }
  0x56   : > { %1833 = dma.hbm_to_vmem [thread:$0]  (!%p2228_p11), %s2226_s10, 4096, %s2232_s13, %s2234_s15, %s2542_s23, %s2542_s23, %s2541_s18  }
  0x57   : > { %p2543_p6 = scmp.ne.s32.totalorder %s2536_s9, 0 }
  0x58   : > { %s2261_s19 = sand.u32 (!%p2543_p6), 1, %s2055_s25   ;;  %p2544_p4 = scmp.ne.s32.totalorder (!%p2543_p6), %s2534_s30, 0 }
  0x59   : > { %292 = sbr.rel (%p2543_p6) target bundleno = 808 (0x328), region = 48  ;;  %s1373_s1 = sshll.u32 (!%p2543_p6), %s2261_s19, 8 }
  0x5a   : > { %s295_s16 = scalar_lea.sflag (!%p2543_p6), [#allocation3], %s2261_s19  ;;  %s2267_s12 = scalar_lea.vmem (!%p2543_p6), [#allocation2], %s1373_s1 }
  0x5e   : > { %2034 = dma.done.wait (%p2544_p4), %s295_s16, 4096  }
  0x5f   : > { %2036 = vsyncadd (%p2544_p4), %s295_s16, 4294963200  ;;  %p2545_p8 = scmp.eq.s32.totalorder %s2135_s28, 0 }
  0x61   : > { %2038 = dma.done.wait (%p2545_p8), [#allocation6], 4096   ;;  %p2546_p3 = pmov %p2545_p8 }
  0x63   : > { %2040 = vsyncadd (%p2546_p3), [#allocation6], 4294963200  ;;  %p2547_p11 = pmov %p2546_p3 }
  0x64   : > { %p2548_p5 = pmov %p2546_p3 }
  0x65   : > { %2042 = dma.done.wait (%p2547_p11), [#allocation9], 2048  }
  0x66   : > { %2044 = vsyncadd (%p2548_p5), [#allocation9], 4294965248  ;;  %v390_v0 = vld [vmem:[#allocation5 + $0x78] sm:$0xff]  ;;  %v389_v1 = vld [vmem:[#allocation5 + $0x70] sm:$0xff]  ;;  %s2405_s11 = scalar_lea.vmem [#allocation10], %s1373_s1  ;;  %s1387_s21 = sshll.u32 %s2135_s28, 12 }
  0x67   : > { %1532 = vmatprep.subr.mxu0 %v390_v0  ;;  %1772 = vmatprep.subr.mxu1 %v390_v0  ;;  %v388_v2 = vld [vmem:[#allocation5 + $0x68] sm:$0xff]  ;;  %v387_v3 = vld [vmem:[#allocation5 + $0x60] sm:$0xff]  ;;  %v386_v5 = vld [vmem:[#allocation5 + $0x58] sm:$0xff]  ;;  %s1261_s22 = sshll.u32 %s2405_s11, 4  ;;  %s2472_s1 = scalar_lea.hbm %s2526_s7, %s1387_s21  ;;  %s2474_s22 = int_to_ptr.vmem [resolvable:$true] %s1261_s22 }
  0x68   : > { %1533 = vmatpush3.msra.mxu0 %v390_v0  ;;  %1788 = vmatpush3.msra.mxu1 %v390_v0  ;;  %v343_v4 = vld [vmem:[%s2267_s12] sm:$0xff]  ;;  %v385_v6 = vld [vmem:[#allocation5 + $0x50] sm:$0xff]  ;;  %v384_v7 = vld [vmem:[#allocation5 + $0x48] sm:$0xff]  ;;  %s1248_s28 = scalar_lea.sflag [#allocation4], %s2261_s19  ;;  %s1991_s16 = scalar_lea.vmem %s2474_s22, 4096 }
  0x69   : > { %1534 = vmatprep.subr.mxu0 %v389_v1  ;;  %1773 = vmatprep.subr.mxu1 %v389_v1  ;;  %v383_v8 = vld [vmem:[#allocation5 + $0x40] sm:$0xff]  ;;  %v382_v9 = vld [vmem:[#allocation5 + $0x38] sm:$0xff]  ;;  %v381_v10 = vld [vmem:[#allocation5 + $0x30] sm:$0xff]  ;;  %p1992_p7 = scmp.ne.s32.totalorder %s2474_s22, %s1991_s16  ;;  %p2549_p1 = scmp.ne.s32.totalorder %s2539_s20, 0 }
  0x6a   : > { %1535 = vmatpush3.msra.mxu0 %v389_v1  ;;  %1789 = vmatpush3.msra.mxu1 %v389_v1  ;;  %v380_v11 = vld [vmem:[#allocation5 + $0x28] sm:$0xff]  ;;  %v379_v12 = vld [vmem:[#allocation5 + $0x20] sm:$0xff]  ;;  %v378_v13 = vld [vmem:[#allocation5 + $0x18] sm:$0xff] }
  0x6b   : > { %1536 = vmatprep.subr.mxu0 %v388_v2  ;;  %1774 = vmatprep.subr.mxu1 %v388_v2  ;;  %v377_v14 = vld [vmem:[#allocation5 + $0x10] sm:$0xff]  ;;  %v376_v15 = vld [vmem:[#allocation5 + $0x8] sm:$0xff]  ;;  %v375_v16 = vld [vmem:[#allocation5] sm:$0xff]  ;;  %p1993_p12 = pnand %p1992_p7, %p2549_p1 }
  0x6c   : > { %1537 = vmatpush3.msra.mxu0 %v388_v2  ;;  %1564 = vmatprep.mubr.f32.mxu0 %v343_v4  ;;  %v344_v17 = vld [vmem:[%s2267_s12 + $0x8] sm:$0xff]  ;;  %v345_v18 = vld [vmem:[%s2267_s12 + $0x10] sm:$0xff]  ;;  %v359_v19 = vld [vmem:[%s2267_s12 + $0x80] sm:$0xff] }
  0x6d   : > { %1538 = vmatprep.subr.mxu0 %v387_v3  ;;  %1790 = vmatpush3.msra.mxu1 %v388_v2  ;;  %v360_v20 = vld [vmem:[%s2267_s12 + $0x88] sm:$0xff]  ;;  %v670_v21 = vld [vmem:[#allocation7 + $0x78] sm:$0xff]  ;;  %v361_v22 = vld [vmem:[%s2267_s12 + $0x90] sm:$0xff]  ;;  %p1994_p9 = pneg %p1993_p12 }
  0x6e   : > { %1539 = vmatpush3.msra.mxu0 %v387_v3  ;;  %1775 = vmatprep.subr.mxu1 %v387_v3  ;;  %v346_v23 = vld [vmem:[%s2267_s12 + $0x18] sm:$0xff]  ;;  %v669_v24 = vld [vmem:[#allocation7 + $0x70] sm:$0xff]  ;;  %v347_v25 = vld [vmem:[%s2267_s12 + $0x20] sm:$0xff] }
  0x6f   : > { %1540 = vmatprep.subr.mxu0 %v386_v5  ;;  %1791 = vmatpush3.msra.mxu1 %v387_v3  ;;  %v362_v26 = vld [vmem:[%s2267_s12 + $0x98] sm:$0xff]  ;;  %v668_v27 = vld [vmem:[#allocation7 + $0x68] sm:$0xff]  ;;  %v363_v28 = vld [vmem:[%s2267_s12 + $0xa0] sm:$0xff] }
  0x70   : > { %1541 = vmatpush3.msra.mxu0 %v386_v5  ;;  %1776 = vmatprep.subr.mxu1 %v386_v5  ;;  %v348_v29 = vld [vmem:[%s2267_s12 + $0x28] sm:$0xff]  ;;  %v667_v30 = vld [vmem:[#allocation7 + $0x60] sm:$0xff]  ;;  %v349_v31 = vld [vmem:[%s2267_s12 + $0x30] sm:$0xff] }
  0x71   : > { %1542 = vmatprep.subr.mxu0 %v385_v6  ;;  %1792 = vmatpush3.msra.mxu1 %v386_v5  ;;  %v364_v32 = vld [vmem:[%s2267_s12 + $0xa8] sm:$0xff]  ;;  %v666_v33 = vld [vmem:[#allocation7 + $0x58] sm:$0xff]  ;;  %v365_v34 = vld [vmem:[%s2267_s12 + $0xb0] sm:$0xff] }
  0x72   : > { %1543 = vmatpush3.msra.mxu0 %v385_v6  ;;  %1777 = vmatprep.subr.mxu1 %v385_v6  ;;  %v350_v35 = vld [vmem:[%s2267_s12 + $0x38] sm:$0xff]  ;;  %v665_v36 = vld [vmem:[#allocation7 + $0x50] sm:$0xff]  ;;  %v351_v37 = vld [vmem:[%s2267_s12 + $0x40] sm:$0xff] }
  0x73   : > { %1544 = vmatprep.subr.mxu0 %v384_v7  ;;  %1793 = vmatpush3.msra.mxu1 %v385_v6  ;;  %v366_v38 = vld [vmem:[%s2267_s12 + $0xb8] sm:$0xff]  ;;  %v664_v39 = vld [vmem:[#allocation7 + $0x48] sm:$0xff]  ;;  %v367_v40 = vld [vmem:[%s2267_s12 + $0xc0] sm:$0xff] }
  0x74   : > { %1545 = vmatpush3.msra.mxu0 %v384_v7  ;;  %1778 = vmatprep.subr.mxu1 %v384_v7  ;;  %v352_v41 = vld [vmem:[%s2267_s12 + $0x48] sm:$0xff]  ;;  %v663_v42 = vld [vmem:[#allocation7 + $0x40] sm:$0xff]  ;;  %v353_v43 = vld [vmem:[%s2267_s12 + $0x50] sm:$0xff] }
  0x75   : > { %1546 = vmatprep.subr.mxu0 %v383_v8  ;;  %1794 = vmatpush3.msra.mxu1 %v384_v7  ;;  %v368_v44 = vld [vmem:[%s2267_s12 + $0xc8] sm:$0xff]  ;;  %v662_v45 = vld [vmem:[#allocation7 + $0x38] sm:$0xff]  ;;  %v369_v46 = vld [vmem:[%s2267_s12 + $0xd0] sm:$0xff] }
  0x76   : > { %1547 = vmatpush3.msra.mxu0 %v383_v8  ;;  %1779 = vmatprep.subr.mxu1 %v383_v8  ;;  %v354_v47 = vld [vmem:[%s2267_s12 + $0x58] sm:$0xff]  ;;  %v661_v48 = vld [vmem:[#allocation7 + $0x30] sm:$0xff]  ;;  %v355_v49 = vld [vmem:[%s2267_s12 + $0x60] sm:$0xff] }
  0x77   : > { %1548 = vmatprep.subr.mxu0 %v382_v9  ;;  %1795 = vmatpush3.msra.mxu1 %v383_v8  ;;  %v370_v50 = vld [vmem:[%s2267_s12 + $0xd8] sm:$0xff]  ;;  %v660_v51 = vld [vmem:[#allocation7 + $0x28] sm:$0xff]  ;;  %v371_v52 = vld [vmem:[%s2267_s12 + $0xe0] sm:$0xff] }
  0x78   : > { %1549 = vmatpush3.msra.mxu0 %v382_v9  ;;  %1780 = vmatprep.subr.mxu1 %v382_v9  ;;  %v356_v53 = vld [vmem:[%s2267_s12 + $0x68] sm:$0xff]  ;;  %v659_v54 = vld [vmem:[#allocation7 + $0x20] sm:$0xff]  ;;  %v357_v55 = vld [vmem:[%s2267_s12 + $0x70] sm:$0xff] }
  0x79   : > { %1550 = vmatprep.subr.mxu0 %v381_v10  ;;  %1796 = vmatpush3.msra.mxu1 %v382_v9  ;;  %v372_v56 = vld [vmem:[%s2267_s12 + $0xe8] sm:$0xff]  ;;  %v658_v57 = vld [vmem:[#allocation7 + $0x18] sm:$0xff]  ;;  %v373_v58 = vld [vmem:[%s2267_s12 + $0xf0] sm:$0xff] }
  0x7a   : > { %1551 = vmatpush3.msra.mxu0 %v381_v10  ;;  %1781 = vmatprep.subr.mxu1 %v381_v10  ;;  %v358_v59 = vld [vmem:[%s2267_s12 + $0x78] sm:$0xff]  ;;  %v657_v61 = vld [vmem:[#allocation7 + $0x10] sm:$0xff]  ;;  %v656_v62 = vld [vmem:[#allocation7 + $0x8] sm:$0xff] }
  0x7b   : > { %1552 = vmatprep.subr.mxu0 %v380_v11  ;;  %1797 = vmatpush3.msra.mxu1 %v381_v10  ;;  %v374_v60 = vld [vmem:[%s2267_s12 + $0xf8] sm:$0xff]  ;;  %v655_v63 = vld [vmem:[#allocation7] sm:$0xff]  ;;  %v949_v1 = vld [vmem:[#allocation8 + $0x70] sm:$0xff]  ;;  %s2071_s12 = smov [#allocation10]  }
  0x7c   : > { %1553 = vmatpush3.msra.mxu0 %v380_v11  ;;  %1782 = vmatprep.subr.mxu1 %v380_v11  ;;  %v950_v0 = vld [vmem:[#allocation8 + $0x78] sm:$0xff]  ;;  %v948_v2 = vld [vmem:[#allocation8 + $0x68] sm:$0xff]  ;;  %v947_v3 = vld [vmem:[#allocation8 + $0x60] sm:$0xff]  ;;  %s1995_s30 = sshll.u32 %s2071_s12, 4  ;;  %s1996_s30 = int_to_ptr.vmem [resolvable:$false] %s1995_s30 }
  0x7d   : > { %1554 = vmatprep.subr.mxu0 %v379_v12  ;;  %1798 = vmatpush3.msra.mxu1 %v380_v11  ;;  %v946_v4 = vld [vmem:[#allocation8 + $0x58] sm:$0xff]  ;;  %v945_v5 = vld [vmem:[#allocation8 + $0x50] sm:$0xff]  ;;  %v944_v6 = vld [vmem:[#allocation8 + $0x48] sm:$0xff]  ;;  %s1997_s9 = scalar_lea.vmem %s1996_s30, 8192  ;;  %p1998_p13 = scmp.lt.s32.totalorder %s2474_s22, %s1996_s30 }
  0x7e   : > { %1555 = vmatpush3.msra.mxu0 %v379_v12  ;;  %1783 = vmatprep.subr.mxu1 %v379_v12  ;;  %v943_v7 = vld [vmem:[#allocation8 + $0x40] sm:$0xff]  ;;  %v942_v8 = vld [vmem:[#allocation8 + $0x38] sm:$0xff]  ;;  %v941_v9 = vld [vmem:[#allocation8 + $0x30] sm:$0xff]  ;;  %p1999_p0 = scmp.lt.s32.totalorder %s1997_s9, %s1991_s16 }
  0x7f   : > { %1556 = vmatprep.subr.mxu0 %v378_v13  ;;  %1799 = vmatpush3.msra.mxu1 %v379_v12  ;;  %v940_v10 = vld [vmem:[#allocation8 + $0x28] sm:$0xff]  ;;  %v939_v11 = vld [vmem:[#allocation8 + $0x20] sm:$0xff]  ;;  %v938_v12 = vld [vmem:[#allocation8 + $0x18] sm:$0xff] }
  0x80   : > { %1557 = vmatpush3.msra.mxu0 %v378_v13  ;;  %1784 = vmatprep.subr.mxu1 %v378_v13  ;;  %p2000_p2 = por %p1999_p0, %p1998_p13 }
  0x81   : > { %1558 = vmatprep.subr.mxu0 %v377_v14  ;;  %1800 = vmatpush3.msra.mxu1 %v378_v13  ;;  %v2316_v13 = vld [vmem:[%s2523_s4] ss:$0 sm:$0xff] }
  0x82   : > { %1559 = vmatpush3.msra.mxu0 %v377_v14  ;;  %1785 = vmatprep.subr.mxu1 %v377_v14  ;;  %p2001_p10 = pnand %p2000_p2, %p1994_p9 }
  0x83   : > { %1560 = vmatprep.subr.mxu0 %v376_v15  ;;  %1801 = vmatpush3.msra.mxu1 %v377_v14 }
  0x84   : > { %1561 = vmatpush3.msra.mxu0 %v376_v15  ;;  %1786 = vmatprep.subr.mxu1 %v376_v15 }
  0x85   : > { %1562 = vmatprep.subr.mxu0 %v375_v16  ;;  %1802 = vmatpush3.msra.mxu1 %v376_v15 }
  0x86   : > { %1563 = vmatpush3.msra.mxu0 %v375_v16  ;;  %1787 = vmatprep.subr.mxu1 %v375_v16 }
  0x87   : > { %1565 = vmatmul.mubr.f32.vlgmr.msra.gmra.mxu0 %v344_v17  ;;  %1803 = vmatpush3.msra.mxu1 %v375_v16 }
  0x88   : > { %1567 = vmatprep.mubr.f32.mxu0 %v345_v18  ;;  %1588 = vmatprep.mubr.f32.mxu1 %v359_v19 }
  0x89   : > { %1589 = vmatmul.mubr.f32.vlgmr.msra.gmra.mxu1 %v360_v20  ;;  %1612 = vmatprep.subr.mxu1 %v670_v21 }
  0x8a   : > { %1591 = vmatprep.mubr.f32.mxu1 %v361_v22  ;;  %1613 = vmatpush3.msra.mxu1 %v670_v21 }
  0x8b   : > { %1568 = vmatmul.mubr.f32.gmra.mxu0 %v346_v23  ;;  %1614 = vmatprep.subr.mxu1 %v669_v24 }
  0x8c   : > { %1570 = vmatprep.mubr.f32.mxu0 %v347_v25  ;;  %1615 = vmatpush3.msra.mxu1 %v669_v24 }
  0x8d   : > { %1592 = vmatmul.mubr.f32.gmra.mxu1 %v362_v26  ;;  %1616 = vmatprep.subr.mxu1 %v668_v27 }
  0x8e   : > { %1594 = vmatprep.mubr.f32.mxu1 %v363_v28  ;;  %1617 = vmatpush3.msra.mxu1 %v668_v27 }
  0x8f   : > { %1571 = vmatmul.mubr.f32.gmra.mxu0 %v348_v29  ;;  %1618 = vmatprep.subr.mxu1 %v667_v30 }
  0x90   : > { %1573 = vmatprep.mubr.f32.mxu0 %v349_v31  ;;  %1619 = vmatpush3.msra.mxu1 %v667_v30 }
  0x91   : > { %1595 = vmatmul.mubr.f32.gmra.mxu1 %v364_v32  ;;  %1620 = vmatprep.subr.mxu1 %v666_v33 }
  0x92   : > { %1597 = vmatprep.mubr.f32.mxu1 %v365_v34  ;;  %1621 = vmatpush3.msra.mxu1 %v666_v33 }
  0x93   : > { %1574 = vmatmul.mubr.f32.gmra.mxu0 %v350_v35  ;;  %1622 = vmatprep.subr.mxu1 %v665_v36 }
  0x94   : > { %1576 = vmatprep.mubr.f32.mxu0 %v351_v37  ;;  %1623 = vmatpush3.msra.mxu1 %v665_v36 }
  0x95   : > { %1598 = vmatmul.mubr.f32.gmra.mxu1 %v366_v38  ;;  %1624 = vmatprep.subr.mxu1 %v664_v39 }
  0x96   : > { %1600 = vmatprep.mubr.f32.mxu1 %v367_v40  ;;  %1625 = vmatpush3.msra.mxu1 %v664_v39 }
  0x97   : > { %1577 = vmatmul.mubr.f32.gmra.mxu0 %v352_v41  ;;  %1626 = vmatprep.subr.mxu1 %v663_v42 }
  0x98   : > { %1579 = vmatprep.mubr.f32.mxu0 %v353_v43  ;;  %1627 = vmatpush3.msra.mxu1 %v663_v42 }
  0x99   : > { %1601 = vmatmul.mubr.f32.gmra.mxu1 %v368_v44  ;;  %1628 = vmatprep.subr.mxu1 %v662_v45 }
  0x9a   : > { %1603 = vmatprep.mubr.f32.mxu1 %v369_v46  ;;  %1629 = vmatpush3.msra.mxu1 %v662_v45 }
  0x9b   : > { %1580 = vmatmul.mubr.f32.gmra.mxu0 %v354_v47  ;;  %1630 = vmatprep.subr.mxu1 %v661_v48 }
  0x9c   : > { %1582 = vmatprep.mubr.f32.mxu0 %v355_v49  ;;  %1631 = vmatpush3.msra.mxu1 %v661_v48 }
  0x9d   : > { %1604 = vmatmul.mubr.f32.gmra.mxu1 %v370_v50  ;;  %1632 = vmatprep.subr.mxu1 %v660_v51 }
  0x9e   : > { %1606 = vmatprep.mubr.f32.mxu1 %v371_v52  ;;  %1633 = vmatpush3.msra.mxu1 %v660_v51 }
  0x9f   : > { %1583 = vmatmul.mubr.f32.gmra.mxu0 %v356_v53  ;;  %1634 = vmatprep.subr.mxu1 %v659_v54 }
  0xa0   : > { %1585 = vmatprep.mubr.f32.mxu0 %v357_v55  ;;  %1635 = vmatpush3.msra.mxu1 %v659_v54 }
  0xa1   : > { %1607 = vmatmul.mubr.f32.gmra.mxu1 %v372_v56  ;;  %1636 = vmatprep.subr.mxu1 %v658_v57 }
  0xa2   : > { %1609 = vmatprep.mubr.f32.mxu1 %v373_v58  ;;  %1637 = vmatpush3.msra.mxu1 %v658_v57 }
  0xa3   : > { %1586 = vmatmul.mubr.f32.gmra.mxu0 %v358_v59  ;;  %1638 = vmatprep.subr.mxu1 %v657_v61 }
  0xa4   : > { %1639 = vmatpush3.msra.mxu1 %v657_v61  ;;  %1692 = vmatprep.subr.mxu0 %v950_v0 }
  0xa5   : > { %1610 = vmatmul.mubr.f32.gmra.mxu1 %v374_v60  ;;  %1640 = vmatprep.subr.mxu1 %v656_v62 }
  0xa6   : > { %1641 = vmatpush3.msra.mxu1 %v656_v62  ;;  %1693 = vmatpush3.msra.mxu0 %v950_v0 }
  0xa7   : > { %1642 = vmatprep.subr.mxu1 %v655_v63  ;;  %1694 = vmatprep.subr.mxu0 %v949_v1 }
  0xa8   : > { %1643 = vmatpush3.msra.mxu1 %v655_v63  ;;  %1695 = vmatpush3.msra.mxu0 %v949_v1 }
  0xa9   : > { %1696 = vmatprep.subr.mxu0 %v948_v2 }
  0xaa   : > { %1697 = vmatpush3.msra.mxu0 %v948_v2 }
  0xab   : > { %1698 = vmatprep.subr.mxu0 %v947_v3 }
  0xac   : > { %1699 = vmatpush3.msra.mxu0 %v947_v3 }
  0xad   : > { %1700 = vmatprep.subr.mxu0 %v946_v4 }
  0xae   : > { %1701 = vmatpush3.msra.mxu0 %v946_v4 }
  0xaf   : > { %1702 = vmatprep.subr.mxu0 %v945_v5 }
  0xb0   : > { %1703 = vmatpush3.msra.mxu0 %v945_v5 }
  0xb1   : > { %1704 = vmatprep.subr.mxu0 %v944_v6 }
  0xb2   : > { %1705 = vmatpush3.msra.mxu0 %v944_v6 }
  0xb3   : > { %1706 = vmatprep.subr.mxu0 %v943_v7 }
  0xb4   : > { %1707 = vmatpush3.msra.mxu0 %v943_v7 }
  0xb5   : > { %1708 = vmatprep.subr.mxu0 %v942_v8 }
  0xb6   : > { %1709 = vmatpush3.msra.mxu0 %v942_v8 }
  0xb7   : > { %1710 = vmatprep.subr.mxu0 %v941_v9 }
  0xb8   : > { %1711 = vmatpush3.msra.mxu0 %v941_v9 }
  0xb9   : > { %1712 = vmatprep.subr.mxu0 %v940_v10 }
  0xba   : > { %1713 = vmatpush3.msra.mxu0 %v940_v10 }
  0xbb   : > { %1714 = vmatprep.subr.mxu0 %v939_v11 }
  0xbc   : > { %1715 = vmatpush3.msra.mxu0 %v939_v11 }
  0xbd   : > { %1716 = vmatprep.subr.mxu0 %v938_v12 }
  0xbe   : > { %1717 = vmatpush3.msra.mxu0 %v938_v12 }
 0x147   : > { %v1566_v14 = vpop.f32.mrf.mxu0 }
 0x148   : > { %v470_v15 = vadd.f32 %v1566_v14, %v2316_v13 }
 0x149   : > { %v464_v16 = vpop.f32.mrf.mxu0  ;;  %v2319_v17 = vpop.f32.mrf.mxu1 }
 0x14a   : > { %v465_v18 = vadd.f32 %v2316_v13, %v464_v16  ;;  %v624_v22 = vmax.f32 %v470_v15, 0.0  ;;  %v550_v11 = vadd.f32 %v2319_v17, %v2316_v13 }
 0x14b   : > { %v1569_v19 = vpop.f32.mrf.mxu0  ;;  %v544_v20 = vpop.f32.mrf.mxu1 }
 0x14c   : > { %v623_v21 = vmax.f32 %v465_v18, 0.0  ;;  %v480_v23 = vadd.f32 %v1569_v19, %v2316_v13  ;;  %v545_v1 = vadd.f32 %v2316_v13, %v544_v20  ;;  %v640_v16 = vmax.f32 %v550_v11, 0.0 }
 0x14d   : > { %v474_v24 = vpop.f32.mrf.mxu0  ;;  %v2323_v25 = vpop.f32.mrf.mxu1 }
 0x14e   : > { %v475_v26 = vadd.f32 %v2316_v13, %v474_v24  ;;  %1644 = vmatprep.mubr.f32.mxu1 %v623_v21  ;;  %v626_v30 = vmax.f32 %v480_v23, 0.0  ;;  %v639_v8 = vmax.f32 %v545_v1, 0.0  ;;  %v560_v18 = vadd.f32 %v2323_v25, %v2316_v13 }
 0x14f   : > { %v1572_v27 = vpop.f32.mrf.mxu0  ;;  %1645 = vmatmul.mubr.f32.vlgmr.msra.gmra.mxu1 %v624_v22  ;;  %v554_v28 = vpop.f32.mrf.mxu1 }
 0x150   : > { %v625_v29 = vmax.f32 %v475_v26, 0.0  ;;  %v490_v31 = vadd.f32 %v1572_v27, %v2316_v13  ;;  %v555_v9 = vadd.f32 %v2316_v13, %v554_v28  ;;  %v642_v22 = vmax.f32 %v560_v18, 0.0 }
 0x151   : > { %v484_v32 = vpop.f32.mrf.mxu0  ;;  %v2327_v33 = vpop.f32.mrf.mxu1 }
 0x152   : > { %v485_v34 = vadd.f32 %v2316_v13, %v484_v32  ;;  %1647 = vmatprep.mubr.f32.mxu1 %v625_v29  ;;  %v628_v37 = vmax.f32 %v490_v31, 0.0  ;;  %v641_v14 = vmax.f32 %v555_v9, 0.0  ;;  %v570_v17 = vadd.f32 %v2327_v33, %v2316_v13 }
 0x153   : > { %v1575_v35 = vpop.f32.mrf.mxu0  ;;  %1648 = vmatmul.mubr.f32.gmra.mxu1 %v626_v30  ;;  %v564_v40 = vpop.f32.mrf.mxu1 }
 0x154   : > { %v627_v36 = vmax.f32 %v485_v34, 0.0  ;;  %v500_v38 = vadd.f32 %v1575_v35, %v2316_v13  ;;  %v565_v15 = vadd.f32 %v2316_v13, %v564_v40  ;;  %v644_v27 = vmax.f32 %v570_v17, 0.0 }
 0x155   : > { %v494_v39 = vpop.f32.mrf.mxu0  ;;  %v1599_v47 = vpop.f32.mrf.mxu1 }
 0x156   : > { %v495_v41 = vadd.f32 %v2316_v13, %v494_v39  ;;  %1650 = vmatprep.mubr.f32.mxu1 %v627_v36  ;;  %v630_v44 = vmax.f32 %v500_v38, 0.0  ;;  %v643_v20 = vmax.f32 %v565_v15, 0.0  ;;  %v580_v28 = vadd.f32 %v1599_v47, %v2316_v13  ;;  %v937_v47 = vld [vmem:[#allocation8 + $0x10] sm:$0xff] }
 0x157   : > { %v1578_v42 = vpop.f32.mrf.mxu0  ;;  %1651 = vmatmul.mubr.f32.gmra.mxu1 %v628_v37  ;;  %v574_v54 = vpop.f32.mrf.mxu1  ;;  %1718 = vmatprep.subr.mxu0 %v937_v47 }
 0x158   : > { %v629_v43 = vmax.f32 %v495_v41, 0.0  ;;  %v510_v45 = vadd.f32 %v1578_v42, %v2316_v13  ;;  %v575_v21 = vadd.f32 %v2316_v13, %v574_v54  ;;  %v646_v31 = vmax.f32 %v580_v28, 0.0  ;;  %1719 = vmatpush3.msra.mxu0 %v937_v47 }
 0x159   : > { %v504_v46 = vpop.f32.mrf.mxu0  ;;  %v1602_v61 = vpop.f32.mrf.mxu1 }
 0x15a   : > { %v505_v48 = vadd.f32 %v2316_v13, %v504_v46  ;;  %1653 = vmatprep.mubr.f32.mxu1 %v629_v43  ;;  %v632_v51 = vmax.f32 %v510_v45, 0.0  ;;  %v645_v24 = vmax.f32 %v575_v21, 0.0  ;;  %v590_v32 = vadd.f32 %v1602_v61, %v2316_v13 }
 0x15b   : > { %v1581_v49 = vpop.f32.mrf.mxu0  ;;  %1654 = vmatmul.mubr.f32.gmra.mxu1 %v630_v44  ;;  %v584_v5 = vpop.f32.mrf.mxu1 }
 0x15c   : > { %v631_v50 = vmax.f32 %v505_v48, 0.0  ;;  %v520_v52 = vadd.f32 %v1581_v49, %v2316_v13  ;;  %v585_v26 = vadd.f32 %v2316_v13, %v584_v5  ;;  %v648_v36 = vmax.f32 %v590_v32, 0.0  ;;  %v936_v48 = vld [vmem:[#allocation8 + $0x8] sm:$0xff]  ;;  %v935_v49 = vld [vmem:[#allocation8] sm:$0xff] }
 0x15d   : > { %v514_v53 = vpop.f32.mrf.mxu0  ;;  %v1605_v12 = vpop.f32.mrf.mxu1  ;;  %1720 = vmatprep.subr.mxu0 %v936_v48 }
 0x15e   : > { %v515_v55 = vadd.f32 %v2316_v13, %v514_v53  ;;  %1656 = vmatprep.mubr.f32.mxu1 %v631_v50  ;;  %v634_v58 = vmax.f32 %v520_v52, 0.0  ;;  %v647_v29 = vmax.f32 %v585_v26, 0.0  ;;  %v600_v37 = vadd.f32 %v1605_v12, %v2316_v13  ;;  %1721 = vmatpush3.msra.mxu0 %v936_v48  ;;  %v2362_v50 = vld [vmem:[%s2524_s5] ss:$0 sm:$0xff] }
 0x15f   : > { %v1584_v56 = vpop.f32.mrf.mxu0  ;;  %1657 = vmatmul.mubr.f32.gmra.mxu1 %v632_v51  ;;  %v594_v19 = vpop.f32.mrf.mxu1  ;;  %1722 = vmatprep.subr.mxu0 %v935_v49 }
 0x160   : > { %v633_v57 = vmax.f32 %v515_v55, 0.0  ;;  %v530_v59 = vadd.f32 %v1584_v56, %v2316_v13  ;;  %v595_v30 = vadd.f32 %v2316_v13, %v594_v19  ;;  %v650_v41 = vmax.f32 %v600_v37, 0.0  ;;  %1723 = vmatpush3.msra.mxu0 %v935_v49 }
 0x161   : > { %v524_v60 = vpop.f32.mrf.mxu0  ;;  %v1608_v23 = vpop.f32.mrf.mxu1 }
 0x162   : > { %v525_v62 = vadd.f32 %v2316_v13, %v524_v60  ;;  %1659 = vmatprep.mubr.f32.mxu1 %v633_v57  ;;  %v636_v2 = vmax.f32 %v530_v59, 0.0  ;;  %v649_v33 = vmax.f32 %v595_v30, 0.0  ;;  %v610_v42 = vadd.f32 %v1608_v23, %v2316_v13 }
 0x163   : > { %v1587_v63 = vpop.f32.mrf.mxu0  ;;  %1660 = vmatmul.mubr.f32.gmra.mxu1 %v634_v58  ;;  %v604_v25 = vpop.f32.mrf.mxu1 }
 0x164   : > { %v635_v0 = vmax.f32 %v525_v62, 0.0  ;;  %v540_v3 = vadd.f32 %v1587_v63, %v2316_v13  ;;  %v605_v35 = vadd.f32 %v2316_v13, %v604_v25  ;;  %v652_v44 = vmax.f32 %v610_v42, 0.0 }
 0x165   : > { %v534_v4 = vpop.f32.mrf.mxu0  ;;  %v1611_v34 = vpop.f32.mrf.mxu1 }
 0x166   : > { %v535_v6 = vadd.f32 %v2316_v13, %v534_v4  ;;  %1662 = vmatprep.mubr.f32.mxu1 %v635_v0  ;;  %v638_v10 = vmax.f32 %v540_v3, 0.0  ;;  %v651_v39 = vmax.f32 %v605_v35, 0.0  ;;  %v620_v45 = vadd.f32 %v1611_v34, %v2316_v13 }
 0x167   : > { %1663 = vmatmul.mubr.f32.gmra.mxu1 %v636_v2  ;;  %v614_v38 = vpop.f32.mrf.mxu1 }
 0x168   : > { %v637_v7 = vmax.f32 %v535_v6, 0.0  ;;  %v615_v40 = vadd.f32 %v2316_v13, %v614_v38  ;;  %v654_v46 = vmax.f32 %v620_v45, 0.0 }
 0x16a   : > { %1665 = vmatprep.mubr.f32.mxu1 %v637_v7  ;;  %v653_v43 = vmax.f32 %v615_v40, 0.0 }
 0x16b   : > { %1666 = vmatmul.mubr.f32.gmra.mxu1 %v638_v10 }
 0x16c   : > { %1668 = vmatprep.mubr.f32.mxu1 %v639_v8 }
 0x16f   : > { %1669 = vmatmul.mubr.f32.gmra.mxu1 %v640_v16 }
 0x170   : > { %1671 = vmatprep.mubr.f32.mxu1 %v641_v14 }
 0x173   : > { %1672 = vmatmul.mubr.f32.gmra.mxu1 %v642_v22 }
 0x174   : > { %1674 = vmatprep.mubr.f32.mxu1 %v643_v20 }
 0x177   : > { %1675 = vmatmul.mubr.f32.gmra.mxu1 %v644_v27 }
 0x178   : > { %1677 = vmatprep.mubr.f32.mxu1 %v645_v24 }
 0x17b   : > { %1678 = vmatmul.mubr.f32.gmra.mxu1 %v646_v31 }
 0x17c   : > { %1680 = vmatprep.mubr.f32.mxu1 %v647_v29 }
 0x17f   : > { %1681 = vmatmul.mubr.f32.gmra.mxu1 %v648_v36 }
 0x180   : > { %1683 = vmatprep.mubr.f32.mxu1 %v649_v33 }
 0x183   : > { %1684 = vmatmul.mubr.f32.gmra.mxu1 %v650_v41 }
 0x184   : > { %1686 = vmatprep.mubr.f32.mxu1 %v651_v39 }
 0x187   : > { %1687 = vmatmul.mubr.f32.gmra.mxu1 %v652_v44 }
 0x188   : > { %1689 = vmatprep.mubr.f32.mxu1 %v653_v43 }
 0x18b   : > { %1690 = vmatmul.mubr.f32.gmra.mxu1 %v654_v46 }
 0x20f   : > { %v1646_v51 = vpop.f32.mrf.mxu1 }
 0x210   : > { %v750_v13 = vadd.f32 %v1646_v51, %v2362_v50 }
 0x211   : > { %v744_v52 = vpop.f32.mrf.mxu1 }
 0x212   : > { %v745_v53 = vadd.f32 %v2362_v50, %v744_v52  ;;  %v904_v56 = vmax.f32 %v750_v13, 0.0 }
 0x213   : > { %v1649_v54 = vpop.f32.mrf.mxu1 }
 0x214   : > { %v903_v55 = vmax.f32 %v745_v53, 0.0  ;;  %v760_v57 = vadd.f32 %v1649_v54, %v2362_v50 }
 0x215   : > { %v754_v58 = vpop.f32.mrf.mxu1 }
 0x216   : > { %v755_v59 = vadd.f32 %v2362_v50, %v754_v58  ;;  %1724 = vmatprep.mubr.f32.mxu0 %v903_v55  ;;  %v906_v62 = vmax.f32 %v760_v57, 0.0 }
 0x217   : > { %v1652_v60 = vpop.f32.mrf.mxu1  ;;  %1725 = vmatmul.mubr.f32.vlgmr.msra.gmra.mxu0 %v904_v56 }
 0x218   : > { %v905_v61 = vmax.f32 %v755_v59, 0.0  ;;  %v770_v63 = vadd.f32 %v1652_v60, %v2362_v50 }
 0x219   : > { %v764_v0 = vpop.f32.mrf.mxu1 }
 0x21a   : > { %v765_v1 = vadd.f32 %v2362_v50, %v764_v0  ;;  %1727 = vmatprep.mubr.f32.mxu0 %v905_v61  ;;  %v908_v4 = vmax.f32 %v770_v63, 0.0 }
 0x21b   : > { %v1655_v2 = vpop.f32.mrf.mxu1  ;;  %1728 = vmatmul.mubr.f32.gmra.mxu0 %v906_v62 }
 0x21c   : > { %v907_v3 = vmax.f32 %v765_v1, 0.0  ;;  %v780_v5 = vadd.f32 %v1655_v2, %v2362_v50 }
 0x21d   : > { %v774_v6 = vpop.f32.mrf.mxu1 }
 0x21e   : > { %v775_v7 = vadd.f32 %v2362_v50, %v774_v6  ;;  %1730 = vmatprep.mubr.f32.mxu0 %v907_v3  ;;  %v910_v10 = vmax.f32 %v780_v5, 0.0 }
 0x21f   : > { %v1658_v8 = vpop.f32.mrf.mxu1  ;;  %1731 = vmatmul.mubr.f32.gmra.mxu0 %v908_v4 }
 0x220   : > { %v909_v9 = vmax.f32 %v775_v7, 0.0  ;;  %v790_v11 = vadd.f32 %v1658_v8, %v2362_v50 }
 0x221   : > { %v784_v12 = vpop.f32.mrf.mxu1 }
 0x222   : > { %v785_v14 = vadd.f32 %v2362_v50, %v784_v12  ;;  %1733 = vmatprep.mubr.f32.mxu0 %v909_v9  ;;  %v912_v18 = vmax.f32 %v790_v11, 0.0 }
 0x223   : > { %v1661_v15 = vpop.f32.mrf.mxu1  ;;  %1734 = vmatmul.mubr.f32.gmra.mxu0 %v910_v10 }
 0x224   : > { %v911_v16 = vmax.f32 %v785_v14, 0.0  ;;  %v800_v19 = vadd.f32 %v1661_v15, %v2362_v50 }
 0x225   : > { %v794_v20 = vpop.f32.mrf.mxu1 }
 0x226   : > { %v795_v21 = vadd.f32 %v2362_v50, %v794_v20  ;;  %1736 = vmatprep.mubr.f32.mxu0 %v911_v16  ;;  %v914_v23 = vmax.f32 %v800_v19, 0.0 }
 0x227   : > { %v1664_v22 = vpop.f32.mrf.mxu1  ;;  %1737 = vmatmul.mubr.f32.gmra.mxu0 %v912_v18 }
 0x228   : > { %v913_v17 = vmax.f32 %v795_v21, 0.0  ;;  %v810_v24 = vadd.f32 %v1664_v22, %v2362_v50  ;;  %v2399_v21 = vld [vmem:[%s2525_s6] ss:$0 sm:$0xff] }
 0x229   : > { %v804_v26 = vpop.f32.mrf.mxu1 }
 0x22a   : > { %v805_v27 = vadd.f32 %v2362_v50, %v804_v26  ;;  %1739 = vmatprep.mubr.f32.mxu0 %v913_v17  ;;  %v916_v29 = vmax.f32 %v810_v24, 0.0 }
 0x22b   : > { %v1667_v28 = vpop.f32.mrf.mxu1  ;;  %1740 = vmatmul.mubr.f32.gmra.mxu0 %v914_v23 }
 0x22c   : > { %v915_v25 = vmax.f32 %v805_v27, 0.0  ;;  %v820_v30 = vadd.f32 %v1667_v28, %v2362_v50 }
 0x22d   : > { %v814_v31 = vpop.f32.mrf.mxu1 }
 0x22e   : > { %v815_v32 = vadd.f32 %v2362_v50, %v814_v31  ;;  %1742 = vmatprep.mubr.f32.mxu0 %v915_v25  ;;  %v918_v35 = vmax.f32 %v820_v30, 0.0 }
 0x22f   : > { %v1670_v34 = vpop.f32.mrf.mxu1  ;;  %1743 = vmatmul.mubr.f32.gmra.mxu0 %v916_v29 }
 0x230   : > { %v917_v33 = vmax.f32 %v815_v32, 0.0  ;;  %v830_v36 = vadd.f32 %v1670_v34, %v2362_v50 }
 0x231   : > { %v824_v37 = vpop.f32.mrf.mxu1 }
 0x232   : > { %v825_v38 = vadd.f32 %v2362_v50, %v824_v37  ;;  %1745 = vmatprep.mubr.f32.mxu0 %v917_v33  ;;  %v920_v41 = vmax.f32 %v830_v36, 0.0 }
 0x233   : > { %v1673_v39 = vpop.f32.mrf.mxu1  ;;  %1746 = vmatmul.mubr.f32.gmra.mxu0 %v918_v35 }
 0x234   : > { %v919_v40 = vmax.f32 %v825_v38, 0.0  ;;  %v840_v42 = vadd.f32 %v1673_v39, %v2362_v50 }
 0x235   : > { %v834_v43 = vpop.f32.mrf.mxu1 }
 0x236   : > { %v835_v44 = vadd.f32 %v2362_v50, %v834_v43  ;;  %1748 = vmatprep.mubr.f32.mxu0 %v919_v40  ;;  %v922_v47 = vmax.f32 %v840_v42, 0.0 }
 0x237   : > { %v1676_v45 = vpop.f32.mrf.mxu1  ;;  %1749 = vmatmul.mubr.f32.gmra.mxu0 %v920_v41 }
 0x238   : > { %v921_v46 = vmax.f32 %v835_v44, 0.0  ;;  %v850_v48 = vadd.f32 %v1676_v45, %v2362_v50 }
 0x239   : > { %v844_v49 = vpop.f32.mrf.mxu1 }
 0x23a   : > { %v845_v51 = vadd.f32 %v2362_v50, %v844_v49  ;;  %1751 = vmatprep.mubr.f32.mxu0 %v921_v46  ;;  %v924_v53 = vmax.f32 %v850_v48, 0.0 }
 0x23b   : > { %v1679_v13 = vpop.f32.mrf.mxu1  ;;  %1752 = vmatmul.mubr.f32.gmra.mxu0 %v922_v47 }
 0x23c   : > { %v923_v52 = vmax.f32 %v845_v51, 0.0  ;;  %v860_v54 = vadd.f32 %v1679_v13, %v2362_v50 }
 0x23d   : > { %v854_v55 = vpop.f32.mrf.mxu1 }
 0x23e   : > { %v855_v56 = vadd.f32 %v2362_v50, %v854_v55  ;;  %1754 = vmatprep.mubr.f32.mxu0 %v923_v52  ;;  %v926_v59 = vmax.f32 %v860_v54, 0.0 }
 0x23f   : > { %v1682_v57 = vpop.f32.mrf.mxu1  ;;  %1755 = vmatmul.mubr.f32.gmra.mxu0 %v924_v53 }
 0x240   : > { %v925_v58 = vmax.f32 %v855_v56, 0.0  ;;  %v870_v60 = vadd.f32 %v1682_v57, %v2362_v50 }
 0x241   : > { %v864_v61 = vpop.f32.mrf.mxu1 }
 0x242   : > { %v865_v62 = vadd.f32 %v2362_v50, %v864_v61  ;;  %1757 = vmatprep.mubr.f32.mxu0 %v925_v58  ;;  %v928_v1 = vmax.f32 %v870_v60, 0.0 }
 0x243   : > { %v1685_v63 = vpop.f32.mrf.mxu1  ;;  %1758 = vmatmul.mubr.f32.gmra.mxu0 %v926_v59 }
 0x244   : > { %v927_v0 = vmax.f32 %v865_v62, 0.0  ;;  %v880_v2 = vadd.f32 %v1685_v63, %v2362_v50 }
 0x245   : > { %v874_v3 = vpop.f32.mrf.mxu1 }
 0x246   : > { %v875_v4 = vadd.f32 %v2362_v50, %v874_v3  ;;  %1760 = vmatprep.mubr.f32.mxu0 %v927_v0  ;;  %v930_v7 = vmax.f32 %v880_v2, 0.0 }
 0x247   : > { %v1688_v5 = vpop.f32.mrf.mxu1  ;;  %1761 = vmatmul.mubr.f32.gmra.mxu0 %v928_v1 }
 0x248   : > { %v929_v6 = vmax.f32 %v875_v4, 0.0  ;;  %v890_v8 = vadd.f32 %v1688_v5, %v2362_v50 }
 0x249   : > { %v884_v9 = vpop.f32.mrf.mxu1 }
 0x24a   : > { %v885_v10 = vadd.f32 %v2362_v50, %v884_v9  ;;  %1763 = vmatprep.mubr.f32.mxu0 %v929_v6  ;;  %v932_v14 = vmax.f32 %v890_v8, 0.0 }
 0x24b   : > { %v1691_v11 = vpop.f32.mrf.mxu1  ;;  %1764 = vmatmul.mubr.f32.gmra.mxu0 %v930_v7 }
 0x24c   : > { %v931_v12 = vmax.f32 %v885_v10, 0.0  ;;  %v900_v15 = vadd.f32 %v1691_v11, %v2362_v50 }
 0x24d   : > { %v894_v16 = vpop.f32.mrf.mxu1 }
 0x24e   : > { %v895_v18 = vadd.f32 %v2362_v50, %v894_v16  ;;  %1766 = vmatprep.mubr.f32.mxu0 %v931_v12  ;;  %v934_v20 = vmax.f32 %v900_v15, 0.0 }
 0x24f   : > { %1767 = vmatmul.mubr.f32.gmra.mxu0 %v932_v14 }
 0x250   : > { %v933_v19 = vmax.f32 %v895_v18, 0.0 }
 0x252   : > { %1769 = vmatprep.mubr.f32.mxu0 %v933_v19 }
 0x253   : > { %1770 = vmatmul.mubr.f32.gmra.mxu0 %v934_v20 }
 0x2d7   : > { %v1726_v22 = vpop.f32.mrf.mxu0 }
 0x2d8   : > { %v1030_v17 = vadd.f32 %v1726_v22, %v2399_v21 }
 0x2d9   : > { %v1024_v23 = vpop.f32.mrf.mxu0 }
 0x2da   : > { %v1184_v24 = vmax.f32 %v1030_v17, 0.0  ;;  %v1025_v26 = vadd.f32 %v2399_v21, %v1024_v23 }
 0x2db   : > { %v1729_v27 = vpop.f32.mrf.mxu0 }
 0x2dc   : > { %1216 = vst [vmem:[%s2405_s11 + $0x8] sm:$0xff] %v1184_v24  ;;  %v1183_v50 = vmax.f32 %v1025_v26, 0.0  ;;  %v1040_v28 = vadd.f32 %v1729_v27, %v2399_v21 }
 0x2dd   : > { %v1034_v25 = vpop.f32.mrf.mxu0 }
 0x2de   : > { %1215 = vst [vmem:[%s2405_s11] sm:$0xff] %v1183_v50  ;;  %v1186_v29 = vmax.f32 %v1040_v28, 0.0  ;;  %v1035_v30 = vadd.f32 %v2399_v21, %v1034_v25 }
 0x2df   : > { %v1732_v31 = vpop.f32.mrf.mxu0 }
 0x2e0   : > { %1218 = vst [vmem:[%s2405_s11 + $0x18] sm:$0xff] %v1186_v29  ;;  %v1185_v32 = vmax.f32 %v1035_v30, 0.0  ;;  %v1050_v34 = vadd.f32 %v1732_v31, %v2399_v21 }
 0x2e1   : > { %v1044_v33 = vpop.f32.mrf.mxu0 }
 0x2e2   : > { %1217 = vst [vmem:[%s2405_s11 + $0x10] sm:$0xff] %v1185_v32  ;;  %v1188_v35 = vmax.f32 %v1050_v34, 0.0  ;;  %v1045_v36 = vadd.f32 %v2399_v21, %v1044_v33 }
 0x2e3   : > { %v1735_v37 = vpop.f32.mrf.mxu0 }
 0x2e4   : > { %1220 = vst [vmem:[%s2405_s11 + $0x28] sm:$0xff] %v1188_v35  ;;  %v1187_v38 = vmax.f32 %v1045_v36, 0.0  ;;  %v1060_v39 = vadd.f32 %v1735_v37, %v2399_v21 }
 0x2e5   : > { %v1054_v40 = vpop.f32.mrf.mxu0 }
 0x2e6   : > { %1219 = vst [vmem:[%s2405_s11 + $0x20] sm:$0xff] %v1187_v38  ;;  %v1190_v41 = vmax.f32 %v1060_v39, 0.0  ;;  %v1055_v42 = vadd.f32 %v2399_v21, %v1054_v40 }
 0x2e7   : > { %v1738_v43 = vpop.f32.mrf.mxu0 }
 0x2e8   : > { %1222 = vst [vmem:[%s2405_s11 + $0x38] sm:$0xff] %v1190_v41  ;;  %v1189_v44 = vmax.f32 %v1055_v42, 0.0  ;;  %v1070_v45 = vadd.f32 %v1738_v43, %v2399_v21 }
 0x2e9   : > { %v1064_v46 = vpop.f32.mrf.mxu0 }
 0x2ea   : > { %1221 = vst [vmem:[%s2405_s11 + $0x30] sm:$0xff] %v1189_v44  ;;  %v1192_v47 = vmax.f32 %v1070_v45, 0.0  ;;  %v1065_v48 = vadd.f32 %v2399_v21, %v1064_v46 }
 0x2eb   : > { %v1741_v49 = vpop.f32.mrf.mxu0 }
 0x2ec   : > { %1224 = vst [vmem:[%s2405_s11 + $0x48] sm:$0xff] %v1192_v47  ;;  %v1191_v51 = vmax.f32 %v1065_v48, 0.0  ;;  %v1080_v13 = vadd.f32 %v1741_v49, %v2399_v21 }
 0x2ed   : > { %v1074_v52 = vpop.f32.mrf.mxu0 }
 0x2ee   : > { %1223 = vst [vmem:[%s2405_s11 + $0x40] sm:$0xff] %v1191_v51  ;;  %v1194_v53 = vmax.f32 %v1080_v13, 0.0  ;;  %v1075_v54 = vadd.f32 %v2399_v21, %v1074_v52 }
 0x2ef   : > { %v1744_v55 = vpop.f32.mrf.mxu0 }
 0x2f0   : > { %1226 = vst [vmem:[%s2405_s11 + $0x58] sm:$0xff] %v1194_v53  ;;  %v1193_v56 = vmax.f32 %v1075_v54, 0.0  ;;  %v1090_v57 = vadd.f32 %v1744_v55, %v2399_v21 }
 0x2f1   : > { %v1084_v58 = vpop.f32.mrf.mxu0 }
 0x2f2   : > { %1225 = vst [vmem:[%s2405_s11 + $0x50] sm:$0xff] %v1193_v56  ;;  %v1196_v59 = vmax.f32 %v1090_v57, 0.0  ;;  %v1085_v60 = vadd.f32 %v2399_v21, %v1084_v58 }
 0x2f3   : > { %v1747_v61 = vpop.f32.mrf.mxu0 }
 0x2f4   : > { %1228 = vst [vmem:[%s2405_s11 + $0x68] sm:$0xff] %v1196_v59  ;;  %v1195_v62 = vmax.f32 %v1085_v60, 0.0  ;;  %v1100_v63 = vadd.f32 %v1747_v61, %v2399_v21 }
 0x2f5   : > { %v1094_v0 = vpop.f32.mrf.mxu0 }
 0x2f6   : > { %1227 = vst [vmem:[%s2405_s11 + $0x60] sm:$0xff] %v1195_v62  ;;  %v1198_v1 = vmax.f32 %v1100_v63, 0.0  ;;  %v1095_v2 = vadd.f32 %v2399_v21, %v1094_v0 }
 0x2f7   : > { %v1750_v3 = vpop.f32.mrf.mxu0 }
 0x2f8   : > { %1230 = vst [vmem:[%s2405_s11 + $0x78] sm:$0xff] %v1198_v1  ;;  %v1197_v4 = vmax.f32 %v1095_v2, 0.0  ;;  %v1110_v5 = vadd.f32 %v1750_v3, %v2399_v21 }
 0x2f9   : > { %v1104_v6 = vpop.f32.mrf.mxu0 }
 0x2fa   : > { %1229 = vst [vmem:[%s2405_s11 + $0x70] sm:$0xff] %v1197_v4  ;;  %v1200_v7 = vmax.f32 %v1110_v5, 0.0  ;;  %v1105_v8 = vadd.f32 %v2399_v21, %v1104_v6 }
 0x2fb   : > { %v1753_v9 = vpop.f32.mrf.mxu0 }
 0x2fc   : > { %1232 = vst [vmem:[%s2405_s11 + $0x88] sm:$0xff] %v1200_v7  ;;  %v1199_v10 = vmax.f32 %v1105_v8, 0.0  ;;  %v1120_v11 = vadd.f32 %v1753_v9, %v2399_v21 }
 0x2fd   : > { %v1114_v12 = vpop.f32.mrf.mxu0 }
 0x2fe   : > { %1231 = vst [vmem:[%s2405_s11 + $0x80] sm:$0xff] %v1199_v10  ;;  %v1202_v14 = vmax.f32 %v1120_v11, 0.0  ;;  %v1115_v15 = vadd.f32 %v2399_v21, %v1114_v12 }
 0x2ff   : > { %v1756_v16 = vpop.f32.mrf.mxu0 }
 0x300   : > { %1234 = vst [vmem:[%s2405_s11 + $0x98] sm:$0xff] %v1202_v14  ;;  %v1201_v18 = vmax.f32 %v1115_v15, 0.0  ;;  %v1130_v19 = vadd.f32 %v1756_v16, %v2399_v21 }
 0x301   : > { %v1124_v20 = vpop.f32.mrf.mxu0 }
 0x302   : > { %1233 = vst [vmem:[%s2405_s11 + $0x90] sm:$0xff] %v1201_v18  ;;  %v1204_v22 = vmax.f32 %v1130_v19, 0.0  ;;  %v1125_v17 = vadd.f32 %v2399_v21, %v1124_v20 }
 0x303   : > { %v1759_v23 = vpop.f32.mrf.mxu0 }
 0x304   : > { %1236 = vst [vmem:[%s2405_s11 + $0xa8] sm:$0xff] %v1204_v22  ;;  %v1203_v24 = vmax.f32 %v1125_v17, 0.0  ;;  %v1140_v26 = vadd.f32 %v1759_v23, %v2399_v21 }
 0x305   : > { %v1134_v27 = vpop.f32.mrf.mxu0 }
 0x306   : > { %1235 = vst [vmem:[%s2405_s11 + $0xa0] sm:$0xff] %v1203_v24  ;;  %v1206_v50 = vmax.f32 %v1140_v26, 0.0  ;;  %v1135_v28 = vadd.f32 %v2399_v21, %v1134_v27 }
 0x307   : > { %v1762_v25 = vpop.f32.mrf.mxu0 }
 0x308   : > { %1238 = vst [vmem:[%s2405_s11 + $0xb8] sm:$0xff] %v1206_v50  ;;  %v1205_v29 = vmax.f32 %v1135_v28, 0.0  ;;  %v1150_v30 = vadd.f32 %v1762_v25, %v2399_v21 }
 0x309   : > { %v1144_v31 = vpop.f32.mrf.mxu0 }
 0x30a   : > { %1237 = vst [vmem:[%s2405_s11 + $0xb0] sm:$0xff] %v1205_v29  ;;  %v1208_v32 = vmax.f32 %v1150_v30, 0.0  ;;  %v1145_v34 = vadd.f32 %v2399_v21, %v1144_v31 }
 0x30b   : > { %v1765_v33 = vpop.f32.mrf.mxu0 }
 0x30c   : > { %1240 = vst [vmem:[%s2405_s11 + $0xc8] sm:$0xff] %v1208_v32  ;;  %v1207_v35 = vmax.f32 %v1145_v34, 0.0  ;;  %v1160_v36 = vadd.f32 %v1765_v33, %v2399_v21 }
 0x30d   : > { %v1154_v37 = vpop.f32.mrf.mxu0 }
 0x30e   : > { %1239 = vst [vmem:[%s2405_s11 + $0xc0] sm:$0xff] %v1207_v35  ;;  %v1210_v38 = vmax.f32 %v1160_v36, 0.0  ;;  %v1155_v39 = vadd.f32 %v2399_v21, %v1154_v37 }
 0x30f   : > { %v1768_v40 = vpop.f32.mrf.mxu0 }
 0x310   : > { %1242 = vst [vmem:[%s2405_s11 + $0xd8] sm:$0xff] %v1210_v38  ;;  %v1209_v41 = vmax.f32 %v1155_v39, 0.0  ;;  %v1170_v42 = vadd.f32 %v1768_v40, %v2399_v21 }
 0x311   : > { %v1164_v43 = vpop.f32.mrf.mxu0 }
 0x312   : > { %1241 = vst [vmem:[%s2405_s11 + $0xd0] sm:$0xff] %v1209_v41  ;;  %v1212_v44 = vmax.f32 %v1170_v42, 0.0  ;;  %v1165_v45 = vadd.f32 %v2399_v21, %v1164_v43 }
 0x313   : > { %v1771_v46 = vpop.f32.mrf.mxu0 }
 0x314   : > { %1244 = vst [vmem:[%s2405_s11 + $0xe8] sm:$0xff] %v1212_v44  ;;  %v1211_v47 = vmax.f32 %v1165_v45, 0.0  ;;  %v1180_v48 = vadd.f32 %v1771_v46, %v2399_v21 }
 0x315   : > { %v1174_v49 = vpop.f32.mrf.mxu0 }
 0x316   : > { %1243 = vst [vmem:[%s2405_s11 + $0xe0] sm:$0xff] %v1211_v47  ;;  %v1214_v51 = vmax.f32 %v1180_v48, 0.0  ;;  %v1175_v13 = vadd.f32 %v2399_v21, %v1174_v49 }
 0x318   : > { %1246 = vst [vmem:[%s2405_s11 + $0xf8] sm:$0xff] %v1214_v51  ;;  %v1213_v52 = vmax.f32 %v1175_v13, 0.0 }
 0x31a   : > { %1245 = vst [vmem:[%s2405_s11 + $0xf0] sm:$0xff] %v1213_v52 }
 0x31b   : > { %2004 = shalt.err (!%p2001_p10)
}
 0x31c   : > { %s2005_s10 = scalar_lea.hbm %s2472_s1, 4096  ;;  %s2009_s29 = scalar_lea.hbm %s2526_s7, 8192 }
 0x31d   : > { %p2006_p6 = scmp.ne.s32.totalorder %s2472_s1, %s2005_s10  ;;  %p2010_p3 = scmp.lt.s32.totalorder %s2472_s1, %s2526_s7 }
 0x31e   : > { %p2011_p11 = scmp.lt.s32.totalorder %s2009_s29, %s2005_s10 }
 0x31f   : > { %p2007_p4 = pnand %p2006_p6, %p2549_p1 }
 0x320   : > { %p2012_p5 = por %p2011_p11, %p2010_p3 }
 0x321   : > { %p2008_p8 = pneg %p2007_p4 }
 0x323   : > { %p2013_p7 = pnand %p2012_p5, %p2008_p8 }
 0x325   : > { %2016 = shalt.err (!%p2013_p7)
}
 0x326   : > { %s2072_s18 = smov 128   ;;  %s2073_s23 = smov 8  }
 0x327   : > { %1818 = dma.vmem_to_hbm [thread:$0]  (%p2549_p1), %s2474_s22, 4096, %s2472_s1, %s1248_s28, %s2072_s18, %s2072_s18, %s2073_s23  }
 0x328 PF: > { %s1276_s16 = sand.u32 1, %s2051_s24   ;;  %p2550_p12 = scmp.ne.s32.totalorder %s2535_s8, 0 }
 0x329   : > { %p2551_p9 = scmp.ge.s32.totalorder %s2063_s27, 2  ;;  %s1277_s12 = scalar_lea.sflag [#allocation4], %s1276_s16 }
 0x32b   : > { %p1835_p13 = pnand %p2551_p9, %p2550_p12 }
 0x32d   : > { %p1836_p0 = pneg %p1835_p13 }
 0x32f   : > { %2046 = dma.done.wait (%p1836_p0), %s1277_s12, 4096  }
 0x330   : > { %2048 = vsyncadd (%p1836_p0), %s1277_s12, 4294963200  ;;  %p22_p2 = scmp.ge.s32.totalorder %s2203_s14, 4   ;;  %s2552_s24 = smov %s2055_s25 }
 0x331   : > { %s2553_s25 = smov %s2059_s26  ;;  %s2554_s26 = smov %s2213_s17 }
 0x332   : > { %s2555_s27 = smov %s2203_s14  ;;  %24 = sbr.rel (!%p22_p2) target bundleno = 9 (0x9), region = 105 }
 0x337   :  { %1282 = vsyncpa [#allocation3], 1 }
 0x338   :  { %1284 = vsyncpa [#allocation3 + $0x1], 1 }
 0x339   :  { %1285 = vsyncpa [#allocation6], 1 }
 0x33a   :  { %1286 = vsyncpa [#allocation9], 1 }
 0x33b   :  { %1287 = vsyncpa [#allocation4], 1 }
 0x33c   :  { %1289 = vsyncpa [#allocation4 + $0x1], 1 }

</bundles_post_ra>
